<compile_context>
chip_gen: v5e
topology: v5e:2x2
jax: 0.10.0
libtpu: 0.0.40
codegen_flags: <defaults>
</compile_context>

<pallas_src>
import jax
import jax.numpy as jnp
from jax import lax
from jax.experimental import pallas as pl
from jax.experimental.pallas import tpu as pltpu

EPS = 1e-6
LANE = 128


def _cdiv(a, b):
    return -(-a // b)


def _round_up(a, m):
    return _cdiv(a, m) * m


# ---------------------------------------------------------------------------
# unfold / fold glue (TPU-friendly: static strided slices, no index gather)
# ---------------------------------------------------------------------------
def _unfold(x, kern, stride):
    """x: (N, C, H, W) -> (N, C, K, L) with K = kh*kw, L = oh*ow (nn.Unfold order)."""
    kh, kw = kern
    sh, sw = stride
    N, C, H, W = x.shape
    oh = (H - kh) // sh + 1
    ow = (W - kw) // sw + 1
    cols = []
    for di in range(kh):
        for dj in range(kw):
            sl = lax.slice(
                x,
                (0, 0, di, dj),
                (N, C, di + sh * (oh - 1) + 1, dj + sw * (ow - 1) + 1),
                (1, 1, sh, sw),
            )  # (N, C, oh, ow)
            cols.append(sl)
    p = jnp.stack(cols, axis=2)  # (N, C, K, oh, ow)
    return p.reshape(N, C, kh * kw, oh * ow)


def _fold(p, out_size, kern, stride):
    """p: (N, C, K, oh, ow) -> (N, C, H, W), overlapping windows summed (nn.Fold)."""
    kh, kw = kern
    sh, sw = stride
    H, W = out_size
    N, C, _, oh, ow = p.shape
    out = jnp.zeros((N, C, H, W), p.dtype)
    idx = 0
    for di in range(kh):
        for dj in range(kw):
            out = out.at[
                :, :, di : di + sh * (oh - 1) + 1 : sh, dj : dj + sw * (ow - 1) + 1 : sw
            ].add(p[:, :, idx])
            idx += 1
    return out


# ---------------------------------------------------------------------------
# Pallas kernels
# ---------------------------------------------------------------------------
def _make_fused_kernel(c_out):
    """Single block-diagonal matmul; exp applied to the abs half via a row mask.

    p_ref: (2*CK, tL)        rows [0,CK) raw rot patches, rows [CK,2CK) log(abs+shift)
    w_ref: (2*C_out, 2*CK)   block-diag [[W_rot,0],[0,W_abs]]
    out_ref: (2*C_out, tL)   one aligned full-tile store.
    """
    def kernel(p_ref, w_ref, out_ref):
        out = jnp.dot(w_ref[...], p_ref[...], preferred_element_type=jnp.float32)
        row = lax.broadcasted_iota(jnp.int32, out.shape, 0)
        # rot rows pass through, abs rows get exp; where() is a cheap VPU select
        # and keeps the store a single unmasked full-tile vst.
        out_ref[...] = jnp.where(row < c_out, out, jnp.exp(out)).astype(out_ref.dtype)
    return kernel


def _make_split_kernel():
    """Fallback when 2*CK exceeds the MXU contraction width: two dots, one store.

    p_ref: (2, CK, tL)   plane 0 = rot patches, plane 1 = log(abs+shift)
    w_ref: (2, C_out, CK)
    """
    def kernel(p_ref, w_ref, out_ref):
        pr = p_ref[0]
        la = p_ref[1]
        out_rot = jnp.dot(w_ref[0], pr, preferred_element_type=jnp.float32)
        out_abs = jnp.exp(jnp.dot(w_ref[1], la, preferred_element_type=jnp.float32))
        out_ref[...] = jnp.concatenate([out_rot, out_abs], axis=0).astype(out_ref.dtype)
    return kernel


# ---------------------------------------------------------------------------
# Module forward (do_conv=True path)
# ---------------------------------------------------------------------------
def complex_conv2d_effgroup(x, params, kern, stride, *, tile_l=1024,
                            compute_dtype=jnp.bfloat16):
    """x: (B, 2, C_in, H, W) float32 -> (B, 2, C_out, out_x, out_y) float32."""
    B, two, C_in, H, W = x.shape
    assert two == 2
    kh, kw = kern
    sh, sw = stride
    K = kh * kw
    ox = (H - kh) // sh + 1
    oy = (W - kw) // sw + 1
    L = ox * oy
    CK = C_in * K

    wmr, wma, wr1, wr2 = params["wmr"], params["wma"], params["wr1"], params["wr2"]
    C_out = wr2.shape[0]

    # ---- weight normalizations (glue, tiny, f32) ----
    w2r = wmr / jnp.sum(wmr ** 2)                                # weightNormalize2
    w1a = wma ** 2 / jnp.sum(wma ** 2)                           # weightNormalize1
    n1 = wr1 ** 2 / jnp.sum(wr1 ** 2)                            # weightNormalize1 (global)
    n2 = wr2 ** 2 / jnp.sum(wr2 ** 2)                            # weightNormalize1 (global)
    r1 = wr1 ** 2 / jnp.sum(wr1 ** 2, axis=1, keepdims=True)     # weightNormalize (row-wise)
    r2 = wr2 ** 2 / jnp.sum(wr2 ** 2, axis=1, keepdims=True)     # weightNormalize (row-wise)

    # combined (C_out, C_in*K) weights: K-reduction + channel mix in one matmul
    w_rot = (n2[:, :, None] * n1[None, :, :]).reshape(C_out, CK)
    w_abs = (r2[:, :, None] * r1[None, :, :]).reshape(C_out, CK)

    # ---- unfold (im2col via static strided slices) ----
    xf = x.reshape(B * 2, C_in, H, W)
    patches = _unfold(xf, kern, stride).reshape(B, 2, CK, L)     # f32

    fused_prescale = (kh, kw) == (sh, sw)   # non-overlapping: fold∘unfold == identity
    if fused_prescale:
        # rot-prescale folded into the weight, abs-shift into the log input
        w_rot = w_rot * w2r.reshape(1, CK)
        p_rot = patches[:, 0]
        p_abs = patches[:, 1] + (w1a.reshape(1, CK, 1) + EPS)
    else:
        # overlapping windows: prescale + fold (overlap-add) + re-unfold in glue
        in_rot = patches[:, 0] * w2r.reshape(1, CK, 1)
        in_abs = patches[:, 1] + w1a.reshape(1, CK, 1)
        stacked = jnp.stack([in_rot, in_abs], axis=1).reshape(B * 2, C_in, K, ox, oy)
        folded = _fold(stacked, (H, W), kern, stride)            # (B*2, C_in, H, W)
        patches2 = _unfold(folded, kern, stride).reshape(B, 2, CK, L)
        p_rot = patches2[:, 0]
        p_abs = patches2[:, 1] + EPS

    # log in f32 inside the same XLA fusion as the unfold producer; only the
    # (bf16) result is written to HBM -> no extra pass, halves patch traffic.
    log_abs = jnp.log(p_abs)

    fuse_matmul = (2 * CK) <= 256   # fits one MXU contraction on v6e/v7x (128 on v5e
                                    # still only costs one extra pass, both tiny here)
    if fuse_matmul:
        rhs = jnp.concatenate([p_rot, log_abs], axis=1).astype(compute_dtype)  # (B,2CK,L)
        zer = jnp.zeros((C_out, CK), jnp.float32)
        w = jnp.concatenate(
            [jnp.concatenate([w_rot, zer], axis=1),
             jnp.concatenate([zer, w_abs], axis=1)], axis=0).astype(compute_dtype)
    else:
        rhs = jnp.stack([p_rot, log_abs], axis=1).astype(compute_dtype)        # (B,2,CK,L)
        w = jnp.stack([w_rot, w_abs], axis=0).astype(compute_dtype)            # (2,C_out,CK)

    # ---- tile selection + explicit VMEM budget (no L padding, no output slice) ----
    itemsize = jnp.dtype(compute_dtype).itemsize

    def footprint(t):
        in_blk = 2 * CK * t * itemsize          # one patch block
        out_blk = 2 * C_out * t * 4             # one f32 output block
        temps = 4 * (2 * C_out * t * 4)         # in-kernel f32 temporaries
        return 2 * in_blk + 2 * out_blk + temps  # double-buffered in/out + temps

    lmax = _round_up(L, LANE)
    tl = max(LANE, min(_round_up(int(tile_l), LANE), lmax))
    budget = 24 << 20                            # fits v5e/v6e/v7x scoped VMEM w/ margin
    while tl > LANE and footprint(tl) > budget:
        tl -= LANE
    if tl >= 256:
        tl -= tl % 256                           # MXU/N-dim occupancy on v6e/v7x
    n_l = _cdiv(L, tl)
    if B * n_l < 2 and tl > LANE:                # v7x: keep >=2 parallel steps (2 TCs)
        tl = max(LANE, _round_up(_cdiv(L, 2), LANE))
        n_l = _cdiv(L, tl)
    vmem_limit = int(min(48 << 20, max(32 << 20, 2 * footprint(tl))))

    out_spec = pl.BlockSpec((pl.Squeezed(), 2 * C_out, tl), lambda b, l: (b, 0, l))
    if fuse_matmul:
        kernel = _make_fused_kernel(C_out)
        in_specs = [
            pl.BlockSpec((pl.Squeezed(), 2 * CK, tl), lambda b, l: (b, 0, l)),
            pl.BlockSpec((2 * C_out, 2 * CK), lambda b, l: (0, 0)),
        ]
    else:
        kernel = _make_split_kernel()
        in_specs = [
            pl.BlockSpec((pl.Squeezed(), 2, CK, tl), lambda b, l: (b, 0, 0, l)),
            pl.BlockSpec((2, C_out, CK), lambda b, l: (0, 0, 0)),
        ]

    out = pl.pallas_call(
        kernel,
        out_shape=jax.ShapeDtypeStruct((B, 2 * C_out, L), jnp.float32),
        grid=(B, n_l),
        in_specs=in_specs,
        out_specs=out_spec,
        compiler_params=pltpu.CompilerParams(
            dimension_semantics=("parallel", "parallel"),
            vmem_limit_bytes=vmem_limit),
    )(rhs, w)

    return out.reshape(B, 2, C_out, ox, oy)


# ---------------------------------------------------------------------------
# Pure-JAX reference (mirrors the PyTorch forward exactly, incl. fold/unfold)
# ---------------------------------------------------------------------------
def reference_forward(x, params, kern, stride):
    B, _, C_in, H, W = x.shape
    kh, kw = kern
    sh, sw = stride
    K = kh * kw
    ox = (H - kh) // sh + 1
    oy = (W - kw) // sw + 1
    wmr, wma, wr1, wr2 = params["wmr"], params["wma"], params["wr1"], params["wr2"]
    C_out = wr2.shape[0]

    patches = _unfold(x.reshape(B * 2, C_in, H, W), kern, stride).reshape(B, 2, C_in, K, -1)
    p_rot, p_abs = patches[:, 0], patches[:, 1]

    in_rot = p_rot * (wmr / jnp.sum(wmr ** 2))[None, :, :, None]
    in_abs = p_abs + (wma ** 2 / jnp.sum(wma ** 2))[None, :, :, None]

    stacked = jnp.stack([in_rot, in_abs], axis=1).reshape(B * 2, C_in, K, ox, oy)
    folded = _fold(stacked, (H, W), kern, stride)
    p2 = _unfold(folded, kern, stride).reshape(B, 2, C_in, K, -1)
    p2_rot, p2_abs = p2[:, 0], p2[:, 1]

    n1 = wr1 ** 2 / jnp.sum(wr1 ** 2)
    n2 = wr2 ** 2 / jnp.sum(wr2 ** 2)
    r1 = wr1 ** 2 / jnp.sum(wr1 ** 2, axis=1, keepdims=True)
    r2 = wr2 ** 2 / jnp.sum(wr2 ** 2, axis=1, keepdims=True)

    rot1 = jnp.einsum("bckl,ck->bcl", p2_rot, n1)
    out_rot = jnp.einsum("bcl,oc->bol", rot1, n2)
    abs1 = jnp.einsum("bckl,ck->bcl", jnp.log(p2_abs + EPS), r1)
    out_abs = jnp.exp(jnp.einsum("bcl,oc->bol", abs1, r2))
    out = jnp.stack([out_rot, out_abs], axis=1)                  # (B, 2, C_out, L)
    return out.reshape(B, 2, C_out, ox, oy)


# ---------------------------------------------------------------------------
if __name__ == "__main__":
    key = jax.random.PRNGKey(0)

    # --- case 1: stride == kern (fused prescale, block-diag matmul) ---
    B, C_in, C_out = 2, 4, 4
    H = W = 32
    kern = (2, 2)
    stride = (2, 2)
    K = kern[0] * kern[1]
    k1, k2, k3, k4, kx = jax.random.split(key, 5)
    params = {
        "wmr": jax.random.uniform(k1, (C_in, K), jnp.float32),      # ComplexConv2Deffgroup.wmr
        "wma": jax.random.uniform(k2, (C_in, K), jnp.float32),      # ComplexConv2Deffgroup.wma
        "wr1": jax.random.uniform(k3, (C_in, K), jnp.float32),      # complex_conv.weight_matrix_rot1
        "wr2": jax.random.uniform(k4, (C_out, C_in), jnp.float32),  # complex_conv.weight_matrix_rot2
    }
    x = jax.random.uniform(kx, (B, 2, C_in, H, W), jnp.float32, minval=0.1, maxval=1.0)

    ref = reference_forward(x, params, kern, stride)

    # exactness check of the kernel math (f32 path, tight tolerance)
    out32 = jax.block_until_ready(
        complex_conv2d_effgroup(x, params, kern, stride, compute_dtype=jnp.float32))
    assert out32.shape == (B, 2, C_out, 16, 16), out32.shape
    assert jnp.allclose(out32, ref, rtol=1e-3, atol=1e-4), float(jnp.max(jnp.abs(out32 - ref)))

    # default bf16-traffic path (tolerance accounts for bf16 patch/weight quantization)
    out = jax.block_until_ready(complex_conv2d_effgroup(x, params, kern, stride))
    assert out.shape == (B, 2, C_out, 16, 16), out.shape
    assert bool(jnp.all(jnp.isfinite(out)))
    assert jnp.allclose(out, ref, rtol=2e-2, atol=2e-3), float(jnp.max(jnp.abs(out - ref)))

    # --- case 2: overlapping windows (stride != kern -> fold path, ragged edge tile) ---
    kern2 = (3, 3)
    stride2 = (1, 1)
    K2 = kern2[0] * kern2[1]
    H2 = W2 = 16
    k5, k6, k7, k8, kx2 = jax.random.split(jax.random.PRNGKey(1), 5)
    params2 = {
        "wmr": jax.random.uniform(k5, (C_in, K2), jnp.float32),
        "wma": jax.random.uniform(k6, (C_in, K2), jnp.float32),
        "wr1": jax.random.uniform(k7, (C_in, K2), jnp.float32),
        "wr2": jax.random.uniform(k8, (C_out, C_in), jnp.float32),
    }
    x2 = jax.random.uniform(kx2, (B, 2, C_in, H2, W2), jnp.float32, minval=0.1, maxval=1.0)

    out2 = jax.block_until_ready(complex_conv2d_effgroup(x2, params2, kern2, stride2))
    ref2 = reference_forward(x2, params2, kern2, stride2)
    assert out2.shape == (B, 2, C_out, 14, 14), out2.shape
    assert bool(jnp.all(jnp.isfinite(out2)))
    assert jnp.allclose(out2, ref2, rtol=2e-2, atol=2e-3), float(jnp.max(jnp.abs(out2 - ref2)))

    print("KERNEL_OK")
</pallas_src>

<mosaic_0001>
module attributes {stable_mosaic.version = 11 : i64} {
  func.func @kernel(%arg0: i32, %arg1: i32, %arg2: memref<1x32x256xf32, #tpu.memory_space<vmem>>, %arg3: memref<8x32xf32, #tpu.memory_space<vmem>>, %arg4: memref<1x8x256xf32, #tpu.memory_space<vmem>>) attributes {dimension_semantics = [#tpu.dimension_semantics<parallel>, #tpu.dimension_semantics<parallel>], iteration_bounds = array<i64: 2, 1>, scalar_prefetch = 0 : i64, scratch_operands = 0 : i64, tpu.core_type = #tpu.core_type<tc>, window_params = [{transform_indices = @transform_0, window_bounds = array<i64: 1, 32, 256>}, {pipeline_mode = #tpu.pipeline_mode<synchronous>, transform_indices = @transform_1, window_bounds = array<i64: 8, 32>}, {transform_indices = @transform_2, window_bounds = array<i64: 1, 8, 256>}]} {
    %c0 = arith.constant 0 : index
    %c0_0 = arith.constant 0 : index
    %0 = vector.load %arg3[%c0, %c0_0] : memref<8x32xf32, #tpu.memory_space<vmem>>, vector<8x32xf32>
    %c0_1 = arith.constant 0 : index
    %c0_2 = arith.constant 0 : index
    %c0_3 = arith.constant 0 : index
    %1 = vector.load %arg2[%c0_1, %c0_2, %c0_3] : memref<1x32x256xf32, #tpu.memory_space<vmem>>, vector<1x32x256xf32>
    %2 = vector.shape_cast %1 : vector<1x32x256xf32> to vector<32x256xf32>
    %cst = arith.constant dense<0.000000e+00> : vector<8x256xf32>
    %3 = tpu.matmul %0, %2, %cst {dimension_numbers = #tpu.dot_dimension_numbers<[1], [0], [0], [1], [0, 0, 1, 1], [], []>} : vector<8x32xf32>, vector<32x256xf32>, vector<8x256xf32> -> vector<8x256xf32>
    %4 = tpu.iota {dimensions = array<i32: 0>} : vector<8x256xi32>
    %c4_i32 = arith.constant 4 : i32
    %5 = vector.broadcast %c4_i32 : i32 to vector<8x256xi32>
    %6 = arith.cmpi slt, %4, %5 : vector<8x256xi32>
    %7 = math.exp %3 : vector<8x256xf32>
    %8 = arith.select %6, %3, %7 : vector<8x256xi1>, vector<8x256xf32>
    %c0_4 = arith.constant 0 : index
    %c0_5 = arith.constant 0 : index
    %c0_6 = arith.constant 0 : index
    %9 = vector.load %arg4[%c0_4, %c0_5, %c0_6] : memref<1x8x256xf32, #tpu.memory_space<vmem>>, vector<1x8x256xf32>
    %10 = vector.shape_cast %9 : vector<1x8x256xf32> to vector<8x256xf32>
    %11 = vector.shape_cast %8 : vector<8x256xf32> to vector<1x8x256xf32>
    tpu.vector_store %arg4[%c0_4, %c0_5, %c0_6], %11 {strides = array<i32>} : memref<1x8x256xf32, #tpu.memory_space<vmem>>, vector<1x8x256xf32>,
    return
  }
  func.func @transform_0(%arg0: i32, %arg1: i32) -> (i32, i32, i32) {
    %c0_i32 = arith.constant 0 : i32
    %c0_i32_0 = arith.constant 0 : i32
    return %arg0, %c0_i32, %arg1 : i32, i32, i32
  }
  func.func @transform_1(%arg0: i32, %arg1: i32) -> (i32, i32) {
    %c0_i32 = arith.constant 0 : i32
    %c0_i32_0 = arith.constant 0 : i32
    %c0_i32_1 = arith.constant 0 : i32
    return %c0_i32, %c0_i32_0 : i32, i32
  }
  func.func @transform_2(%arg0: i32, %arg1: i32) -> (i32, i32, i32) {
    %c0_i32 = arith.constant 0 : i32
    %c0_i32_0 = arith.constant 0 : i32
    return %arg0, %c0_i32, %arg1 : i32, i32, i32
  }
}

</mosaic_0001>

<bundles_post_ra>
// kernel: tpu_custom_call.1
= control target key start
LH: loop header
LB: loop body
LE: loop exit
PB: predicated region body
PF: predicated region fallthrough
CT: control target
= control target key end

     0   :  { %7 = vsyncpa [#allocation3], 0  ;;  %s794_s0 = inlined_call_operand.hbm [shape: f32[2,32,256], index: 0, kind: input, shape index: {}]   ;;  %s795_s1 = inlined_call_operand.hbm [shape: f32[8,32], index: 1, kind: input, shape index: {}]   ;;  %s796_s2 = inlined_call_operand.hbm [shape: f32[2,8,256], index: 2, kind: output, shape index: {}]  }
   0x1   :  { %9 = vsyncpa [#allocation3 + $0x1], 0 }
   0x2   :  { %10 = vsyncpa [#allocation6], 0 }
   0x3   :  { %11 = vsyncpa [#allocation4], 0 }
   0x4   :  { %13 = vsyncpa [#allocation4 + $0x1], 0  ;;  %s642_s9 = smov 0   ;;  %s644_s10 = smov 0  }
   0x5   :  { %s646_s11 = smov 0   ;;  %s648_s12 = smov 0  }
   0x6   :  { %s650_s13 = smov 0   ;;  %s652_s14 = smov 0  }
   0x7 LB: > { %s376_s15 = sadd.s32 4294967295, %s622_s14   ;;  %s377_s16 = sadd.s32 4294967294, %s622_s14   ;;  %s622_s14 = sphi %s652_s14, %s19_s14   ;;  %s618_s13 = sphi %s650_s13, %s808_s13   ;;  %s614_s12 = sphi %s648_s12, %s807_s12   ;;  %s610_s11 = sphi %s646_s11, %s806_s11   ;;  %s606_s10 = sphi %s644_s10, %s805_s10   ;;  %s602_s9 = sphi %s642_s9, %s804_s9  }
   0x8   : > { %s40_s17 = sadd.s32 1, %s610_s11  ;;  %p47_p0 = scmp.ne.s32.totalorder %s610_s11, %s606_s10 }
   0x9   : > { %p48_p1 = scmp.eq.s32.totalorder %s622_s14, 0  ;;  %p53_p2 = scmp.ne.s32.totalorder %s606_s10, %s602_s9 }
   0xa   : > { %p680_p3 = scmp.eq.s32.totalorder %s376_s15, 0  ;;  %p100_p4 = scmp.eq.s32.totalorder %s376_s15, 1 }
   0xb   : > { %p684_p5 = por %p48_p1, %p47_p0  ;;  %p106_p6 = scmp.eq.s32.totalorder %s377_s16, 1 }
   0xc   : > { %p690_p7 = por %p680_p3, %p53_p2  ;;  %p694_p8 = por %p100_p4, %p47_p0 }
   0xd   : > { %p698_p9 = por %p106_p6, %p53_p2  ;;  %p378_p10 = scmp.ge.s32.totalorder %s622_s14, 1 }
   0xe   : > { %p113_p11 = scmp.lt.s32.totalorder %s622_s14, 3  ;;  %s125_s25 = sshll.u32 %s795_s1, 4  ;;  %s126_s25 = int_to_ptr.hbm [resolvable:$true] %s125_s25 }
   0xf   : > { %s624_s27 = smov [#allocation5]   ;;  %p380_p13 = scmp.ge.s32.totalorder %s622_s14, 2 }
  0x10   : > { %p707_p12 = pnand %p378_p10, %p113_p11  ;;  %s127_s28 = sshll.u32 %s624_s27, 4  ;;  %s128_s28 = int_to_ptr.vmem [resolvable:$true] %s127_s28 }
  0x11   : > { %p418_p1 = scmp.lt.s32.totalorder %s622_s14, 2  ;;  %s31_s30 = sadd.s32 1, %s618_s13 }
  0x12   : > { %p405_p0 = pneg %p707_p12  ;;  %p33_p6 = scmp.ge.s32.totalorder %s31_s30, 2 }
  0x13   : > { %p719_p4 = pnand %p418_p1, %p684_p5  ;;  %s138_s3 = sand.u32 1, %s610_s11  }
  0x14   : > { %p406_p2 = pnand %p405_p0, %p680_p3  ;;  %s810_s30 = smov (%p33_p6, %s31_s30), 0 }
  0x15   : > { %s381_s4 = sshll.u32 %s138_s3, 6  ;;  %s35_s5 = ssub.s32 %s618_s13, %s810_s30 }
  0x16   : > { %408 = dma.hbm_to_vmem [thread:$0]  (!%p406_p2), %s126_s25, 128, %s128_s28, [#allocation6]  }
  0x17   : > { %p38_p10 = scmp.eq.s32.totalorder %s35_s5, 0  ;;  %s395_s6 = sshll.u32 %s618_s13, 6 }
  0x18   : > { %s149_s15 = scalar_lea.hbm %s794_s0, %s395_s6  ;;  %s142_s16 = scalar_lea.vmem [#allocation2], %s381_s4 }
  0x19   : > { %s152_s19 = sshll.u32 %s142_s16, 4  ;;  %s150_s24 = sshll.u32 %s149_s15, 4  ;;  %s153_s19 = int_to_ptr.vmem [resolvable:$true] %s152_s19  ;;  %s151_s24 = int_to_ptr.hbm [resolvable:$true] %s150_s24 }
  0x1a   : > { %s736_s23 = scalar_select %p38_p10, %s610_s11, %s40_s17  }
  0x1b   : > { %s139_s25 = scalar_lea.sflag [#allocation3], %s138_s3  ;;  %s625_s27 = smov 256  }
  0x1c   : > { %s626_s28 = smov 16   ;;  %164 = sbr.rel (%p707_p12) target bundleno = 184 (0xb8), region = 28 }
  0x1d   : > { %412 = dma.hbm_to_vmem [thread:$0]  (!%p719_p4), %s151_s24, 1024, %s153_s19, %s139_s25, %s625_s27, %s625_s27, %s626_s28  }
  0x1e   : > { %s743_s5 = sand.u32 (!%p707_p12), 1, %s606_s10  }
  0x1f   : > { %s385_s4 = sshll.u32 (!%p707_p12), %s743_s5, 6  ;;  %s167_s17 = scalar_lea.sflag (!%p707_p12), [#allocation3], %s743_s5 }
  0x20   : > { %s170_s6 = scalar_lea.vmem (!%p707_p12), [#allocation2], %s385_s4 }
  0x21   : > { %589 = dma.done.wait (%p690_p7), %s167_s17, 1024  }
  0x22   : > { %591 = vsyncadd (%p690_p7), %s167_s17, 4294966272 }
  0x23   : > { %593 = dma.done.wait (%p680_p3), [#allocation6], 128  }
  0x24   : > { %595 = vsyncadd (%p680_p3), [#allocation6], 4294967168  ;;  %v206_v0 = vld [vmem:[%s170_s6 + $0x30] sm:$0xff]  ;;  %v207_v1 = vld [vmem:[%s170_s6 + $0x38] sm:$0xff]  ;;  %vm208_vm0 = vcmask 261120   ;;  %v252_v9 = vlaneseq  ;;  %s387_s18 = sshll.u32 %s743_s5, 4 }
  0x25   : > { %v204_v2 = vld [vmem:[%s170_s6 + $0x20] sm:$0xff]  ;;  %224 = vmatpush.msra.mxu0 %v206_v0  ;;  %244 = vmatpush.msra.mxu1 %v207_v1  ;;  %v205_v3 = vld [vmem:[%s170_s6 + $0x28] sm:$0xff]  ;;  %v202_v4 = vld [vmem:[%s170_s6 + $0x10] sm:$0xff]  ;;  %s396_s20 = sshll.u32 %s614_s12, 4  ;;  %s196_s7 = scalar_lea.vmem [#allocation7], %s387_s18 }
  0x26   : > { %v203_v5 = vld [vmem:[%s170_s6 + $0x18] sm:$0xff]  ;;  %v200_v6 = vld [vmem:[%s170_s6] sm:$0xff]  ;;  %v201_v7 = vld [vmem:[%s170_s6 + $0x8] sm:$0xff]  ;;  %v253_v14 = vshrl.u32 %v252_v9, 7  ;;  %s277_s3 = scalar_lea.hbm %s796_s2, %s396_s20  ;;  %s279_s8 = sshll.u32 %s196_s7, 4  ;;  %s280_s8 = int_to_ptr.vmem [resolvable:$true] %s279_s8 }
  0x27   : > { %225 = vmatpush.msra.mxu0 %v204_v2  ;;  %245 = vmatpush.msra.mxu1 %v205_v3  ;;  %v199_v8 = vld [vmem:[#allocation5] sm:$0xff]  ;;  %s281_s15 = sshll.u32 %s277_s3, 4  ;;  %s264_s12 = scalar_lea.sflag [#allocation4], %s743_s5  ;;  %s282_s15 = int_to_ptr.hbm [resolvable:$true] %s281_s15 }
  0x28   : > { %vm254_vm1 = vcmp.lt.s32.totalorder %v253_v14, 4  ;;  %s550_s16 = sshra.s32 %s282_s15, 4  ;;  %s556_s27 = scalar_lea.hbm %s796_s2, 32  ;;  %s551_s16 = int_to_ptr.hbm [resolvable:$true] %s550_s16 }
  0x29   : > { %226 = vmatpush.msra.mxu0 %v202_v4  ;;  %246 = vmatpush.msra.mxu1 %v203_v5  ;;  %s552_s19 = scalar_lea.hbm %s551_s16, 16  ;;  %p557_p11 = scmp.lt.s32.totalorder %s551_s16, %s796_s2 }
  0x2a   : > { %p553_p3 = scmp.ne.s32.totalorder %s551_s16, %s552_s19  ;;  %p558_p12 = scmp.lt.s32.totalorder %s556_s27, %s552_s19 }
  0x2b   : > { %227 = vmatpush.msra.mxu0 %v200_v6  ;;  %247 = vmatpush.msra.mxu1 %v201_v7 }
  0x2c   : > { %388 = vmatmul.msk.f32.vlgmr.msra.gmra.mxu0 %vm208_vm0, %v199_v8  ;;  %389 = vmatmul.msk.f32.vlgmr.msra.gmra.mxu1 %vm208_vm0, %v199_v8  ;;  %p554_p5 = pnand %p553_p3, %p694_p8  ;;  %p559_p0 = por %p558_p12, %p557_p11 }
  0x2e   : > { %p555_p7 = pneg %p554_p5 }
  0x30   : > { %p560_p1 = pnand %p559_p0, %p555_p7 }
  0xa9   : > { %v229_v10 = vpop.f32.mrf.mxu0  ;;  %v249_v11 = vpop.f32.mrf.mxu1 }
  0xaa   : > { %v255_v12 = vmul.f32 1.442695, %v229_v10  ;;  %v257_v13 = vmul.f32 1.442695, %v249_v11 }
  0xac   : > { %472 = vpow2.f32 %v255_v12 }
  0xad   : > { %474 = vpow2.f32 %v257_v13 }
  0xb2   : > { %v473_v15 = vpop.eup %472 }
  0xb3   : > { %v475_v16 = vpop.eup %474  ;;  %v259_v17 = vsel %vm254_vm1, %v229_v10, %v473_v15 }
  0xb4   : > { %261 = vst [vmem:[%s196_s7] sm:$0xff] %v259_v17  ;;  %v260_v18 = vsel %vm254_vm1, %v249_v11, %v475_v16 }
  0xb5   : > { %262 = vst [vmem:[%s196_s7 + $0x8] sm:$0xff] %v260_v18 }
  0xb6   : > { %563 = shalt.err (!%p560_p1)
}
  0xb7   : > { %403 = dma.vmem_to_hbm [thread:$0]  (%p694_p8), %s280_s8, 256, %s282_s15, %s264_s12  }
  0xb8 PF: > { %s293_s5 = sand.u32 1, %s602_s9   ;;  %p414_p2 = pnand %p380_p13, %p698_p9 }
  0xb9   : > { %s294_s17 = scalar_lea.sflag [#allocation4], %s293_s5 }
  0xba   : > { %p415_p4 = pneg %p414_p2 }
  0xbc   : > { %597 = dma.done.wait (%p415_p4), %s294_s17, 256  }
  0xbd   : > { %599 = vsyncadd (%p415_p4), %s294_s17, 4294967040  ;;  %s19_s14 = sadd.s32 1, %s622_s14   ;;  %s804_s9 = smov %s606_s10 }
  0xbe   : > { %p16_p6 = scmp.ge.s32.totalorder %s19_s14, 4   ;;  %s805_s10 = smov %s610_s11 }
  0xbf   : > { %s806_s11 = smov %s736_s23  ;;  %s807_s12 = smov %s618_s13 }
  0xc0   : > { %s808_s13 = smov %s810_s30  ;;  %18 = sbr.rel (!%p16_p6) target bundleno = 7 (0x7), region = 77 }
  0xc5   :  { %300 = vsyncpa [#allocation3], 1 }
  0xc6   :  { %302 = vsyncpa [#allocation3 + $0x1], 1 }
  0xc7   :  { %303 = vsyncpa [#allocation6], 1 }
  0xc8   :  { %304 = vsyncpa [#allocation4], 1 }
  0xc9   :  { %306 = vsyncpa [#allocation4 + $0x1], 1 }

</bundles_post_ra>
